<compile_context>
chip_gen: v6e
topology: v6e:2x2x1
jax: 0.10.0
libtpu: 0.0.40
codegen_flags: <defaults>
</compile_context>

<pallas_src>
import functools

import jax
import jax.numpy as jnp
from jax.experimental import pallas as pl
from jax.experimental.pallas import tpu as pltpu


def _rmsnorm_kernel(x_ref, w_ref, o_ref, *, eps, inv_hidden):
    # Compute in float32 (mirrors hidden_states.to(torch.float32)).
    x = x_ref[...].astype(jnp.float32)                          # (tm, H)
    # mean(x*x) as sum(x*x) * (1/H); the divide is hoisted into a constant.
    ss = jnp.sum(x * x, axis=-1, keepdims=True) * inv_hidden    # (tm, 1)
    inv = jax.lax.rsqrt(ss + eps)                               # EUP rsqrt
    # torch: weight * hidden_states.to(input_dtype)
    y = (x * inv).astype(x_ref.dtype)                           # .to(input_dtype)
    # weight was pre-cast to the promoted/output dtype in the wrapper, so this
    # multiply already happens in the result dtype (no per-step promote work).
    o_ref[...] = (w_ref[...] * y).astype(o_ref.dtype)


def _round_up(n: int, m: int) -> int:
    return ((n + m - 1) // m) * m


def _vmem_limit_bytes() -> int:
    """Generation-aware scoped-VMEM limit: ~3/4 of physical, capped at 96 MiB."""
    phys = 64 * 1024 * 1024  # conservative default == v7x per-TC VMEM
    try:
        info = pltpu.get_tpu_info()
        cap = int(getattr(info, "vmem_capacity_bytes", 0))
        if cap > 0:
            phys = cap
    except Exception:
        pass
    # v7x (64 MiB) -> 48 MiB scoped; v5e/v6e (128 MiB) -> 96 MiB scoped.
    return int(min(96 * 1024 * 1024, max(32 * 1024 * 1024, (phys * 3) // 4)))


def rmsnorm(hidden_states: jax.Array, weight: jax.Array, eps: float = 1e-6) -> jax.Array:
    """RMSNorm over the last axis, matching the PyTorch module semantics."""
    orig_shape = hidden_states.shape
    hidden = orig_shape[-1]
    assert weight.shape == (hidden,)

    in_dtype = hidden_states.dtype
    out_dtype = jnp.result_type(weight.dtype, in_dtype)

    x2d = hidden_states.reshape(-1, hidden)
    rows = x2d.shape[0]

    # Upcasting the weight to the promoted dtype is exact; doing it once in the
    # wrapper removes a per-tile VPU promote (matters on v5e: no bf16 VALUs).
    w2d = weight.astype(out_dtype).reshape(1, hidden)

    # --- Byte-budgeted row tile ---------------------------------------------
    in_item = jnp.dtype(in_dtype).itemsize
    out_item = jnp.dtype(out_dtype).itemsize
    # Sublane packing of the input dtype: 8 rows (32-bit), 16 (bf16/fp16), 32 (8-bit).
    pack = 8 * max(1, 4 // in_item)

    # Per-row VMEM footprint, using the lane-padded width Mosaic allocates
    # internally: double-buffered input + double-buffered output + ~2 block-sized
    # float32 intermediates from the in-kernel upcast (x, x*inv).
    hp = max(128, _round_up(hidden, 128))
    per_row_bytes = hp * (2 * in_item + 2 * out_item + 2 * 4)

    vmem_limit = _vmem_limit_bytes()
    budget = (vmem_limit * 7) // 10  # headroom for compiler internal scratch

    tm_vmem = max(pack, (budget // per_row_bytes) // pack * pack)
    # Keep >= 4 grid steps when rows allow, so the 'parallel' row axis can be
    # sharded across both TensorCores on v7x (per-step overhead ~0.35us is
    # negligible on single-TC chips).
    tm_split = max(pack, _round_up(-(-rows // 4), pack))
    tm_rows = max(pack, _round_up(rows, pack))
    # Clamp by bytes / rows only — no arbitrary row cap (narrow-hidden shapes
    # benefit from large blocks to amortize per-step overhead).
    tm = min(tm_vmem, tm_split, tm_rows)

    grid = (pl.cdiv(rows, tm),)

    kernel = functools.partial(
        _rmsnorm_kernel, eps=float(eps), inv_hidden=1.0 / float(hidden)
    )

    out2d = pl.pallas_call(
        kernel,
        out_shape=jax.ShapeDtypeStruct((rows, hidden), out_dtype),
        grid_spec=pltpu.PrefetchScalarGridSpec(
            num_scalar_prefetch=0,
            grid=grid,
            in_specs=[
                # Last block dim == full array dim -> exempt from the 128-lane
                # divisibility rule; lane padding handled internally by Mosaic.
                pl.BlockSpec((tm, hidden), lambda i: (i, 0)),
                # Constant block index -> the tiny weight tile is not re-DMA'd
                # per grid step.
                pl.BlockSpec((1, hidden), lambda i: (0, 0)),
            ],
            out_specs=pl.BlockSpec((tm, hidden), lambda i: (i, 0)),
        ),
        compiler_params=pltpu.CompilerParams(
            # Row axis is fully parallel -> shards across the 2 TCs on v7x.
            dimension_semantics=("parallel",),
            vmem_limit_bytes=vmem_limit,
        ),
    )(x2d, w2d)

    return out2d.reshape(orig_shape)


if __name__ == "__main__":
    def ref_rmsnorm(x, w, eps):
        xf = x.astype(jnp.float32)
        var = jnp.mean(xf * xf, axis=-1, keepdims=True)
        return w * (xf * jax.lax.rsqrt(var + eps)).astype(x.dtype)

    eps = 1e-6
    key = jax.random.PRNGKey(0)
    k1, k2, k3 = jax.random.split(key, 3)

    # Case 1: small, matches the module's init (weight = ones), hidden < 128.
    batch, seq, hidden = 2, 8, 32
    x = jax.random.normal(k1, (batch, seq, hidden), dtype=jnp.float32)
    weight = jnp.ones((hidden,), dtype=jnp.float32)
    out = jax.block_until_ready(rmsnorm(x, weight, eps))
    ref = ref_rmsnorm(x, weight, eps)
    assert out.shape == ref.shape and out.dtype == ref.dtype
    assert jnp.allclose(out, ref, atol=1e-5, rtol=1e-5)

    # Case 2: non-128-aligned hidden, non-trivial weight, partial last row tile.
    rows2, hidden2 = 34, 160
    x2 = jax.random.normal(k2, (rows2, hidden2), dtype=jnp.float32)
    w2 = 0.5 + jax.random.uniform(k3, (hidden2,), dtype=jnp.float32)
    out2 = jax.block_until_ready(rmsnorm(x2, w2, eps))
    ref2 = ref_rmsnorm(x2, w2, eps)
    assert out2.shape == ref2.shape and out2.dtype == ref2.dtype
    assert jnp.allclose(out2, ref2, atol=1e-5, rtol=1e-5)

    print("KERNEL_OK")
</pallas_src>

<mosaic_0001>
module attributes {stable_mosaic.version = 11 : i64} {
  func.func @_rmsnorm_kernel(%arg0: i32, %arg1: memref<8x32xf32, #tpu.memory_space<vmem>>, %arg2: memref<1x32xf32, #tpu.memory_space<vmem>>, %arg3: memref<8x32xf32, #tpu.memory_space<vmem>>) attributes {dimension_semantics = [#tpu.dimension_semantics<parallel>], iteration_bounds = array<i64: 2>, scalar_prefetch = 0 : i64, scratch_operands = 0 : i64, tpu.core_type = #tpu.core_type<tc>, window_params = [{transform_indices = @transform_0, window_bounds = array<i64: 8, 32>}, {pipeline_mode = #tpu.pipeline_mode<synchronous>, transform_indices = @transform_1, window_bounds = array<i64: 1, 32>}, {transform_indices = @transform_2, window_bounds = array<i64: 8, 32>}]} {
    %c0 = arith.constant 0 : index
    %c0_0 = arith.constant 0 : index
    %0 = vector.load %arg1[%c0, %c0_0] : memref<8x32xf32, #tpu.memory_space<vmem>>, vector<8x32xf32>
    %1 = arith.mulf %0, %0 : vector<8x32xf32>
    %cst = arith.constant dense<0.000000e+00> : vector<8xf32>
    %2 = vector.multi_reduction <add>, %1, %cst [1] : vector<8x32xf32> to vector<8xf32>
    %3 = vector.shape_cast %2 : vector<8xf32> to vector<8x1xf32>
    %cst_1 = arith.constant 3.125000e-02 : f32
    %4 = vector.broadcast %cst_1 : f32 to vector<8x1xf32>
    %5 = arith.mulf %3, %4 : vector<8x1xf32>
    %cst_2 = arith.constant 9.99999997E-7 : f32
    %6 = vector.broadcast %cst_2 : f32 to vector<8x1xf32>
    %7 = arith.addf %5, %6 : vector<8x1xf32>
    %8 = math.rsqrt %7 : vector<8x1xf32>
    %9 = vector.broadcast %8 : vector<8x1xf32> to vector<8x32xf32>
    %10 = arith.mulf %0, %9 : vector<8x32xf32>
    %c0_3 = arith.constant 0 : index
    %c0_4 = arith.constant 0 : index
    %11 = vector.load %arg2[%c0_3, %c0_4] : memref<1x32xf32, #tpu.memory_space<vmem>>, vector<1x32xf32>
    %12 = vector.broadcast %11 : vector<1x32xf32> to vector<8x32xf32>
    %13 = arith.mulf %12, %10 : vector<8x32xf32>
    %c0_5 = arith.constant 0 : index
    %c0_6 = arith.constant 0 : index
    %14 = vector.load %arg3[%c0_5, %c0_6] : memref<8x32xf32, #tpu.memory_space<vmem>>, vector<8x32xf32>
    tpu.vector_store %arg3[%c0_5, %c0_6], %13 {strides = array<i32>} : memref<8x32xf32, #tpu.memory_space<vmem>>, vector<8x32xf32>,
    return
  }
  func.func @transform_0(%arg0: i32) -> (i32, i32) {
    %c0_i32 = arith.constant 0 : i32
    %c0_i32_0 = arith.constant 0 : i32
    return %arg0, %c0_i32 : i32, i32
  }
  func.func @transform_1(%arg0: i32) -> (i32, i32) {
    %c0_i32 = arith.constant 0 : i32
    %c0_i32_0 = arith.constant 0 : i32
    %c0_i32_1 = arith.constant 0 : i32
    return %c0_i32, %c0_i32_0 : i32, i32
  }
  func.func @transform_2(%arg0: i32) -> (i32, i32) {
    %c0_i32 = arith.constant 0 : i32
    %c0_i32_0 = arith.constant 0 : i32
    return %arg0, %c0_i32 : i32, i32
  }
}

</mosaic_0001>

<bundles_post_ra>
// kernel: tpu_custom_call.1
= control target key start
LH: loop header
LB: loop body
LE: loop exit
PB: predicated region body
PF: predicated region fallthrough
CT: control target
= control target key end

     0   :  { %7 = vsyncpa [#allocation3], 0  ;;  %s580_s0 = inlined_call_operand.hbm [shape: f32[16,32], index: 0, kind: input, shape index: {}]   ;;  %s581_s1 = inlined_call_operand.vmem [shape: f32[1,32], index: 1, kind: input, shape index: {}]   ;;  %s582_s2 = inlined_call_operand.hbm [shape: f32[16,32], index: 2, kind: output, shape index: {}]  }
   0x1   :  { %9 = vsyncpa [#allocation3 + $0x1], 0 }
   0x2   :  { %10 = vsyncpa [#allocation4], 0 }
   0x3   :  { %12 = vsyncpa [#allocation4 + $0x1], 0  ;;  %s434_s9 = smov 0   ;;  %s436_s10 = smov 0  }
   0x4   :  { %s438_s11 = smov 0   ;;  %s440_s12 = smov 0  }
   0x5 LB: > { %s455_s13 = sadd.s32 4294967295, %s415_s12   ;;  %s262_s14 = sadd.s32 4294967294, %s415_s12   ;;  %s415_s12 = sphi %s440_s12, %s599_s12   ;;  %s411_s11 = sphi %s438_s11, %s598_s11   ;;  %s407_s10 = sphi %s436_s10, %s597_s10   ;;  %s403_s9 = sphi %s434_s9, %s596_s9  }
   0x6   : > { %s459_s15 = sadd.s32 1, %s415_s12   ;;  %s25_s16 = sadd.s32 1, %s411_s11 }
   0x7   : > { %s22_s17 = ssub.s32 %s415_s12, %s459_s15  ;;  %p32_p0 = scmp.ne.s32.totalorder %s411_s11, %s407_s10 }
   0x8   : > { %p23_p1 = scmp.eq.s32.totalorder %s22_s17, 0  ;;  %p33_p2 = scmp.eq.s32.totalorder %s415_s12, 0 }
   0x9   : > { %p38_p3 = scmp.ne.s32.totalorder %s407_s10, %s403_s9  ;;  %p39_p4 = scmp.eq.s32.totalorder %s455_s13, 0 }
   0xa   : > { %s471_s18 = scalar_select %p23_p1, %s411_s11, %s25_s16  }
   0xb   : > { %p473_p5 = por %p33_p2, %p32_p0  ;;  %p477_p6 = por %p39_p4, %p38_p3 }
   0xc   : > { %p83_p7 = scmp.eq.s32.totalorder %s455_s13, 1  ;;  %p89_p8 = scmp.eq.s32.totalorder %s262_s14, 1 }
   0xd   : > { %s586_s20 = scalar_select %p477_p6, 1, 0 }
   0xe   : > { %p287_p10 = scmp.lt.s32.totalorder %s415_s12, 2  ;;  %p484_p11 = por %p83_p7, %p32_p0 }
   0xf   : > { %p488_p12 = por %p89_p8, %p38_p3  ;;  %s112_s23 = sand.u32 1, %s411_s11  }
  0x10   : > { %s587_s21 = scalar_select %p484_p11, 1, 0 }
  0x11   : > { %s588_s22 = scalar_select %p488_p12, 1, 0 }
  0x12   : > { %s266_s24 = sshll.u32 %s415_s12, 7  ;;  %s265_s25 = sshll.u32 %s112_s23, 3 }
  0x13   : > { %s497_s28 = scalar_lea.hbm %s580_s0, %s266_s24  ;;  %s116_s29 = scalar_lea.vmem [#allocation2], %s265_s25 }
  0x14   : > { %s123_s30 = sshll.u32 %s116_s29, 4  ;;  %p501_p13 = pnand %p287_p10, %p473_p5  ;;  %s505_s30 = int_to_ptr.vmem [resolvable:$true] %s123_s30 }
  0x15   : > { %s113_s4 = scalar_lea.sflag [#allocation3], %s112_s23  ;;  %s323_s5 = scalar_lea.hbm %s497_s28, 128 }
  0x16   : > { %p324_p2 = scmp.ne.s32.totalorder %s497_s28, %s323_s5  ;;  %p325_p3 = pneg %p501_p13 }
  0x17   : > { %s328_s8 = scalar_lea.hbm %s580_s0, 256  ;;  %p329_p5 = scmp.lt.s32.totalorder %s497_s28, %s580_s0 }
  0x18   : > { %p326_p4 = pnand %p325_p3, %p324_p2  ;;  %p330_p8 = scmp.lt.s32.totalorder %s328_s8, %s323_s5 }
  0x1a   : > { %p327_p7 = pneg %p326_p4  ;;  %p331_p10 = por %p330_p8, %p329_p5 }
  0x1c   : > { %p332_p9 = pnand %p331_p10, %p327_p7 }
  0x1e   : > { %335 = shalt.err (!%p332_p9)
}
  0x1f   : > { %s336_s17 = scalar_lea.vmem %s505_s30, 128  ;;  %s417_s19 = smov [#allocation2]  }
  0x20   : > { %p337_p0 = scmp.ne.s32.totalorder %s505_s30, %s336_s17  ;;  %s341_s23 = sshll.u32 %s417_s19, 4  ;;  %s342_s23 = int_to_ptr.vmem [resolvable:$false] %s341_s23 }
  0x21   : > { %s343_s24 = scalar_lea.vmem %s342_s23, 256  ;;  %p344_p4 = scmp.lt.s32.totalorder %s505_s30, %s342_s23 }
  0x22   : > { %p339_p1 = pnand %p337_p0, %p325_p3  ;;  %p345_p12 = scmp.lt.s32.totalorder %s343_s24, %s336_s17 }
  0x24   : > { %p340_p2 = pneg %p339_p1  ;;  %p346_p11 = por %p345_p12, %p344_p4 }
  0x26   : > { %p347_p6 = pnand %p346_p11, %p340_p2 }
  0x28   : > { %350 = shalt.err (!%p347_p6)
}
  0x29   : > { %282 = dma.hbm_to_vmem [thread:$0]  (!%p501_p13), %s497_s28, 128, %s505_s30, %s113_s4  }
  0x2a   : > { %p590_p9 = scmp.lt.s32.totalorder %s415_s12, 3  ;;  %p591_p7 = scmp.ge.s32.totalorder %s415_s12, 1 }
  0x2c   : > { %p129_p0 = pnand %p591_p7, %p590_p9 }
  0x2d   : > { %s532_s25 = sand.u32 (!%p129_p0), 1, %s407_s10   ;;  %p592_p6 = scmp.ne.s32.totalorder (!%p129_p0), %s586_s20, 0 }
  0x2e   : > { %132 = sbr.rel (%p129_p0) target bundleno = 229 (0xe5), region = 28  ;;  %s268_s26 = sshll.u32 (!%p129_p0), %s532_s25, 3 }
  0x2f   : > { %s135_s27 = scalar_lea.sflag (!%p129_p0), [#allocation3], %s532_s25  ;;  %s138_s29 = scalar_lea.vmem (!%p129_p0), [#allocation2], %s268_s26 }
  0x33   : > { %394 = dma.done.wait (%p592_p6), %s135_s27, 128  }
  0x34   : > { %396 = vsyncadd (%p592_p6), %s135_s27, 4294967168  ;;  %v159_v0 = vld [vmem:[%s138_s29] sm:$0xff]  ;;  %vm161_vm0 = vcmask 261120   ;;  %s272_s20 = sshll.u32 %s455_s13, 7  ;;  %s158_s3 = scalar_lea.vmem [#allocation5], %s268_s26 }
  0x35   : > { %v160_v1 = vmul.f32 %v159_v0, %v159_v0  ;;  %v270_v7 = vld [vmem:[%s581_s1] ss:$0 sm:$0xff]  ;;  %s192_s4 = sshll.u32 %s158_s3, 4  ;;  %s190_s7 = scalar_lea.hbm %s582_s2, %s272_s20  ;;  %s193_s4 = int_to_ptr.vmem [resolvable:$true] %s192_s4 }
  0x36   : > { %s179_s8 = scalar_lea.sflag [#allocation4], %s532_s25  ;;  %s351_s14 = scalar_lea.vmem %s193_s4, 128 }
  0x37   : > { %v162_v2 = vsel %vm161_vm0, %v160_v1, 0.0  ;;  %p352_p11 = scmp.ne.s32.totalorder %s193_s4, %s351_s14  ;;  %p593_p12 = scmp.ne.s32.totalorder %s587_s21, 0 }
  0x38   : > { %163 = vadd.xlane.f32.xlu0 %v162_v2  ;;  %s418_s16 = smov [#allocation5]  }
  0x39   : > { %p353_p13 = pnand %p352_p11, %p593_p12  ;;  %s355_s17 = sshll.u32 %s418_s16, 4  ;;  %s356_s17 = int_to_ptr.vmem [resolvable:$false] %s355_s17 }
  0x3a   : > { %s357_s13 = scalar_lea.vmem %s356_s17, 256  ;;  %p358_p3 = scmp.lt.s32.totalorder %s193_s4, %s356_s17 }
  0x3b   : > { %p354_p1 = pneg %p353_p13  ;;  %p359_p5 = scmp.lt.s32.totalorder %s357_s13, %s351_s14 }
  0x3d   : > { %p360_p8 = por %p359_p5, %p358_p3 }
  0x3f   : > { %p361_p10 = pnand %p360_p8, %p354_p1 }
  0xc1   : > { %v164_v3 = vpop.xlane.xlu0 %163 }
  0xc2   : > { %v165_v4 = vmul.f32 0.03125, %v164_v3 }
  0xc4   : > { %v166_v5 = vadd.f32 1e-06, %v165_v4 }
  0xc6   : > { %321 = vrsqrt.f32 %v166_v5 }
  0xd3   : > { %v322_v6 = vpop.eup %321 }
  0xd4   : > { %v168_v8 = vmul.f32 %v322_v6, %v159_v0 }
  0xd6   : > { %v176_v9 = vmul.f32 %v270_v7, %v168_v8 }
  0xd8   : > { %177 = vst.msk [vmem:[%s158_s3] sm:$0xff] %vm161_vm0, %v176_v9 }
  0xd9   : > { %364 = shalt.err (!%p361_p10)
}
  0xda   : > { %s365_s19 = scalar_lea.hbm %s190_s7, 128  ;;  %s369_s25 = scalar_lea.hbm %s582_s2, 256 }
  0xdb   : > { %p366_p2 = scmp.ne.s32.totalorder %s190_s7, %s365_s19  ;;  %p370_p7 = scmp.lt.s32.totalorder %s190_s7, %s582_s2 }
  0xdc   : > { %p371_p0 = scmp.lt.s32.totalorder %s369_s25, %s365_s19 }
  0xdd   : > { %p367_p4 = pnand %p366_p2, %p593_p12 }
  0xde   : > { %p372_p6 = por %p371_p0, %p370_p7 }
  0xdf   : > { %p368_p9 = pneg %p367_p4 }
  0xe1   : > { %p373_p11 = pnand %p372_p6, %p368_p9 }
  0xe3   : > { %376 = shalt.err (!%p373_p11)
}
  0xe4   : > { %277 = dma.vmem_to_hbm [thread:$0]  (%p593_p12), %s193_s4, 128, %s190_s7, %s179_s8  }
  0xe5 PF: > { %s204_s29 = sand.u32 1, %s403_s9   ;;  %p594_p13 = scmp.ne.s32.totalorder %s588_s22, 0 }
  0xe6   : > { %p595_p1 = scmp.ge.s32.totalorder %s415_s12, 2  ;;  %s205_s28 = scalar_lea.sflag [#allocation4], %s204_s29 }
  0xe8   : > { %p284_p3 = pnand %p595_p1, %p594_p13 }
  0xea   : > { %p285_p5 = pneg %p284_p3 }
  0xec   : > { %398 = dma.done.wait (%p285_p5), %s205_s28, 128  }
  0xed   : > { %400 = vsyncadd (%p285_p5), %s205_s28, 4294967168  ;;  %p15_p8 = scmp.ge.s32.totalorder %s459_s15, 4   ;;  %s596_s9 = smov %s407_s10 }
  0xee   : > { %s597_s10 = smov %s411_s11  ;;  %s598_s11 = smov %s471_s18 }
  0xef   : > { %s599_s12 = smov %s459_s15  ;;  %17 = sbr.rel (!%p15_p8) target bundleno = 5 (0x5), region = 73 }
  0xf4   :  { %210 = vsyncpa [#allocation3], 1 }
  0xf5   :  { %212 = vsyncpa [#allocation3 + $0x1], 1 }
  0xf6   :  { %213 = vsyncpa [#allocation4], 1 }
  0xf7   :  { %215 = vsyncpa [#allocation4 + $0x1], 1 }

</bundles_post_ra>
